<compile_context>
chip_gen: v7x
topology: tpu7x:2x2x1
jax: 0.10.0
libtpu: 0.0.40
codegen_flags: <defaults>
</compile_context>

<pallas_src>
import functools

import jax
import jax.numpy as jnp
import numpy as np
from jax.experimental import pallas as pl
from jax.experimental.pallas import tpu as pltpu


def _round_up(x, m):
    return ((x + m - 1) // m) * m


def _pick_tile(dim, pref, align):
    """Full (aligned) dim if small, otherwise the preferred tile size."""
    return pref if dim >= pref else _round_up(dim, align)


def _noisy_linear_kernel(x_ref, wmu_ref, wsig_ref, weps_ref,
                         bmu_ref, bsig_ref, beps_ref, o_ref, acc_ref,
                         *, use_bf16_matmul):
    k = pl.program_id(2)

    @pl.when(k == 0)
    def _():
        # Fold the noisy bias into the accumulator init: computed once per
        # (batch, out) tile, no separate epilogue add.
        b = bmu_ref[...] + bsig_ref[...] * beps_ref[...]            # (1, tn)
        acc_ref[...] = jnp.broadcast_to(b, acc_ref.shape)

    # Fused noisy-weight construction on the VPU (never round-trips to HBM).
    w = wmu_ref[...] + wsig_ref[...] * weps_ref[...]                # (tn, tk)
    x = x_ref[...]                                                  # (tm, tk)
    if use_bf16_matmul:
        # Optional bf16 MXU path (v6e/v7x throughput); f32 accumulation kept.
        x = x.astype(jnp.bfloat16)
        w = w.astype(jnp.bfloat16)

    # Contract the shared last (In) dim of both operands directly on the MXU —
    # no materialized w.T through the XLU.
    acc_ref[...] += jax.lax.dot_general(
        x, w,
        dimension_numbers=(((1,), (1,)), ((), ())),
        preferred_element_type=jnp.float32)

    @pl.when(k == pl.num_programs(2) - 1)
    def _():
        o_ref[...] = acc_ref[...].astype(o_ref.dtype)


def noisy_linear(x, weight_mu, weight_sigma, weight_epsilon,
                 bias_mu, bias_sigma, bias_epsilon,
                 *, tile_m=256, tile_n=256, tile_k=256,
                 use_bf16_matmul=False):
    """Pallas TPU implementation of NoisyLinear.forward.

    x:        (B, In)   float32
    weight_*: (Out, In) float32
    bias_*:   (Out,)    float32
    returns:  (B, Out)  float32
    """
    B, In = x.shape
    Out, In_w = weight_mu.shape
    assert In == In_w, "weight / input feature mismatch"

    # Tile sizes: (8,128)-aligned; 256 defaults fit v7x's 32 MiB scoped VMEM
    # with double-buffering of all 4 streamed operands.
    tm = _pick_tile(B, tile_m, 8)
    tn = _pick_tile(Out, tile_n, 128)
    tk = _pick_tile(In, tile_k, 128)

    B_pad = _round_up(B, tm)
    Out_pad = _round_up(Out, tn)
    In_pad = _round_up(In, tk)

    f32 = jnp.float32
    x_p = jnp.pad(x.astype(f32), ((0, B_pad - B), (0, In_pad - In)))
    pad_w = lambda w: jnp.pad(w.astype(f32),
                              ((0, Out_pad - Out), (0, In_pad - In)))
    pad_b = lambda b: jnp.pad(b.astype(f32),
                              ((0, Out_pad - Out),)).reshape(1, Out_pad)

    wmu_p, wsig_p, weps_p = (pad_w(weight_mu), pad_w(weight_sigma),
                             pad_w(weight_epsilon))
    bmu_p, bsig_p, beps_p = (pad_b(bias_mu), pad_b(bias_sigma),
                             pad_b(bias_epsilon))

    grid = (B_pad // tm, Out_pad // tn, In_pad // tk)

    x_spec = pl.BlockSpec((tm, tk), lambda i, j, k: (i, k))
    w_spec = pl.BlockSpec((tn, tk), lambda i, j, k: (j, k))
    b_spec = pl.BlockSpec((1, tn), lambda i, j, k: (0, j))
    o_spec = pl.BlockSpec((tm, tn), lambda i, j, k: (i, j))

    out = pl.pallas_call(
        functools.partial(_noisy_linear_kernel,
                          use_bf16_matmul=use_bf16_matmul),
        out_shape=jax.ShapeDtypeStruct((B_pad, Out_pad), f32),
        grid_spec=pltpu.PrefetchScalarGridSpec(
            num_scalar_prefetch=0,
            grid=grid,
            in_specs=[x_spec, w_spec, w_spec, w_spec,
                      b_spec, b_spec, b_spec],
            out_specs=o_spec,
            scratch_shapes=[pltpu.VMEM((tm, tn), jnp.float32)],
        ),
        compiler_params=pltpu.CompilerParams(
            dimension_semantics=("parallel", "parallel", "arbitrary")),
    )(x_p, wmu_p, wsig_p, weps_p, bmu_p, bsig_p, beps_p)

    return out[:B, :Out]


def init_noisy_linear_params(key, in_features, out_features, sigma_init=0.017):
    """Deterministic parameter / noise-buffer initialization mirroring __init__."""
    k_wmu, k_bmu, k_weps, k_beps = jax.random.split(key, 4)
    bound = np.sqrt(3.0 / in_features)

    weight_mu = jax.random.uniform(
        k_wmu, (out_features, in_features), jnp.float32, -bound, bound)
    weight_sigma = jnp.full((out_features, in_features), sigma_init, jnp.float32)

    # The reference leaves bias_mu effectively uninitialized; give it a
    # deterministic uniform init with the same bound so forward is well-defined.
    bias_mu = jax.random.uniform(
        k_bmu, (out_features,), jnp.float32, -bound, bound)
    bias_sigma = jnp.full((out_features,), sigma_init, jnp.float32)

    # _noise(): standard-normal epsilon buffers.
    weight_epsilon = jax.random.normal(
        k_weps, (out_features, in_features), jnp.float32)
    bias_epsilon = jax.random.normal(k_beps, (out_features,), jnp.float32)

    return (weight_mu, weight_sigma, weight_epsilon,
            bias_mu, bias_sigma, bias_epsilon)


def _reference(x, params):
    wmu, wsig, weps, bmu, bsig, beps = (np.asarray(p, np.float64) for p in params)
    x = np.asarray(x, np.float64)
    return x @ (wmu + wsig * weps).T + (bmu + bsig * beps)


if __name__ == "__main__":
    key = jax.random.PRNGKey(0)

    # Case 1: the module's typical tiny DQN-head shapes (exercises padding to
    # lane-dense (8, 128) tiles).
    # Case 2: non-aligned, multi-k-tile shapes (exercises the grid/accumulator).
    cases = [
        (2, 32, 16),      # batch, in_features, out_features
        (24, 300, 200),
    ]

    ok = True
    for idx, (batch, in_features, out_features) in enumerate(cases):
        key, k_x, k_p = jax.random.split(key, 3)
        params = init_noisy_linear_params(k_p, in_features, out_features)
        x = jax.random.normal(k_x, (batch, in_features), jnp.float32)

        out = noisy_linear(x, *params)
        out = jax.block_until_ready(out)

        ref = _reference(x, params)
        np.testing.assert_allclose(np.asarray(out, np.float64), ref,
                                   rtol=1e-4, atol=1e-4)

    if ok:
        print("KERNEL_OK")
</pallas_src>

<mosaic_0001>
module attributes {stable_mosaic.version = 11 : i64} {
  func.func @_noisy_linear_kernel(%arg0: i32, %arg1: i32, %arg2: i32, %arg3: memref<8x128xf32, #tpu.memory_space<vmem>>, %arg4: memref<128x128xf32, #tpu.memory_space<vmem>>, %arg5: memref<128x128xf32, #tpu.memory_space<vmem>>, %arg6: memref<128x128xf32, #tpu.memory_space<vmem>>, %arg7: memref<1x128xf32, #tpu.memory_space<vmem>>, %arg8: memref<1x128xf32, #tpu.memory_space<vmem>>, %arg9: memref<1x128xf32, #tpu.memory_space<vmem>>, %arg10: memref<8x128xf32, #tpu.memory_space<vmem>>, %arg11: memref<8x128xf32, #tpu.memory_space<vmem>>) attributes {dimension_semantics = [#tpu.dimension_semantics<parallel>, #tpu.dimension_semantics<parallel>, #tpu.dimension_semantics<arbitrary>], iteration_bounds = array<i64: 1, 1, 1>, scalar_prefetch = 0 : i64, scratch_operands = 1 : i64, tpu.core_type = #tpu.core_type<tc>, window_params = [{transform_indices = @transform_0, window_bounds = array<i64: 8, 128>}, {transform_indices = @transform_1, window_bounds = array<i64: 128, 128>}, {transform_indices = @transform_2, window_bounds = array<i64: 128, 128>}, {transform_indices = @transform_3, window_bounds = array<i64: 128, 128>}, {transform_indices = @transform_4, window_bounds = array<i64: 1, 128>}, {transform_indices = @transform_5, window_bounds = array<i64: 1, 128>}, {transform_indices = @transform_6, window_bounds = array<i64: 1, 128>}, {transform_indices = @transform_7, window_bounds = array<i64: 8, 128>}]} {
    %c0_i32 = arith.constant 0 : i32
    %0 = arith.cmpi eq, %arg2, %c0_i32 : i32
    %1 = arith.extui %0 : i1 to i32
    %c0_i32_0 = arith.constant 0 : i32
    %2 = arith.cmpi ne, %1, %c0_i32_0 : i32
    scf.if %2 {
      %c0_14 = arith.constant 0 : index
      %c0_15 = arith.constant 0 : index
      %16 = vector.load %arg7[%c0_14, %c0_15] : memref<1x128xf32, #tpu.memory_space<vmem>>, vector<1x128xf32>
      %c0_16 = arith.constant 0 : index
      %c0_17 = arith.constant 0 : index
      %17 = vector.load %arg8[%c0_16, %c0_17] : memref<1x128xf32, #tpu.memory_space<vmem>>, vector<1x128xf32>
      %c0_18 = arith.constant 0 : index
      %c0_19 = arith.constant 0 : index
      %18 = vector.load %arg9[%c0_18, %c0_19] : memref<1x128xf32, #tpu.memory_space<vmem>>, vector<1x128xf32>
      %19 = arith.mulf %17, %18 : vector<1x128xf32>
      %20 = arith.addf %16, %19 : vector<1x128xf32>
      %21 = vector.shape_cast %20 : vector<1x128xf32> to vector<1x128xf32>
      %22 = vector.broadcast %21 : vector<1x128xf32> to vector<8x128xf32>
      %c0_20 = arith.constant 0 : index
      %c0_21 = arith.constant 0 : index
      %23 = vector.load %arg11[%c0_20, %c0_21] : memref<8x128xf32, #tpu.memory_space<vmem>>, vector<8x128xf32>
      tpu.vector_store %arg11[%c0_20, %c0_21], %22 {strides = array<i32>} : memref<8x128xf32, #tpu.memory_space<vmem>>, vector<8x128xf32>,
    } else {
    }
    %c0 = arith.constant 0 : index
    %c0_1 = arith.constant 0 : index
    %3 = vector.load %arg4[%c0, %c0_1] : memref<128x128xf32, #tpu.memory_space<vmem>>, vector<128x128xf32>
    %c0_2 = arith.constant 0 : index
    %c0_3 = arith.constant 0 : index
    %4 = vector.load %arg5[%c0_2, %c0_3] : memref<128x128xf32, #tpu.memory_space<vmem>>, vector<128x128xf32>
    %c0_4 = arith.constant 0 : index
    %c0_5 = arith.constant 0 : index
    %5 = vector.load %arg6[%c0_4, %c0_5] : memref<128x128xf32, #tpu.memory_space<vmem>>, vector<128x128xf32>
    %6 = arith.mulf %4, %5 : vector<128x128xf32>
    %7 = arith.addf %3, %6 : vector<128x128xf32>
    %c0_6 = arith.constant 0 : index
    %c0_7 = arith.constant 0 : index
    %8 = vector.load %arg3[%c0_6, %c0_7] : memref<8x128xf32, #tpu.memory_space<vmem>>, vector<8x128xf32>
    %c0_8 = arith.constant 0 : index
    %c0_9 = arith.constant 0 : index
    %9 = vector.load %arg11[%c0_8, %c0_9] : memref<8x128xf32, #tpu.memory_space<vmem>>, vector<8x128xf32>
    %cst = arith.constant dense<0.000000e+00> : vector<8x128xf32>
    %10 = tpu.matmul %8, %7, %cst {dimension_numbers = #tpu.dot_dimension_numbers<[1], [1], [0], [0], [0, 0, 1, 0], [], []>} : vector<8x128xf32>, vector<128x128xf32>, vector<8x128xf32> -> vector<8x128xf32>
    %11 = arith.addf %9, %10 : vector<8x128xf32>
    %c0_10 = arith.constant 0 : index
    %c0_11 = arith.constant 0 : index
    %12 = vector.load %arg11[%c0_10, %c0_11] : memref<8x128xf32, #tpu.memory_space<vmem>>, vector<8x128xf32>
    tpu.vector_store %arg11[%c0_10, %c0_11], %11 {strides = array<i32>} : memref<8x128xf32, #tpu.memory_space<vmem>>, vector<8x128xf32>,
    %c0_i32_12 = arith.constant 0 : i32
    %13 = arith.cmpi eq, %arg2, %c0_i32_12 : i32
    %14 = arith.extui %13 : i1 to i32
    %c0_i32_13 = arith.constant 0 : i32
    %15 = arith.cmpi ne, %14, %c0_i32_13 : i32
    scf.if %15 {
      %c0_14 = arith.constant 0 : index
      %c0_15 = arith.constant 0 : index
      %16 = vector.load %arg11[%c0_14, %c0_15] : memref<8x128xf32, #tpu.memory_space<vmem>>, vector<8x128xf32>
      %c0_16 = arith.constant 0 : index
      %c0_17 = arith.constant 0 : index
      %17 = vector.load %arg10[%c0_16, %c0_17] : memref<8x128xf32, #tpu.memory_space<vmem>>, vector<8x128xf32>
      tpu.vector_store %arg10[%c0_16, %c0_17], %16 {strides = array<i32>} : memref<8x128xf32, #tpu.memory_space<vmem>>, vector<8x128xf32>,
    } else {
    }
    return
  }
  func.func @transform_0(%arg0: i32, %arg1: i32, %arg2: i32) -> (i32, i32) {
    %c0_i32 = arith.constant 0 : i32
    return %arg0, %arg2 : i32, i32
  }
  func.func @transform_1(%arg0: i32, %arg1: i32, %arg2: i32) -> (i32, i32) {
    %c0_i32 = arith.constant 0 : i32
    return %arg1, %arg2 : i32, i32
  }
  func.func @transform_2(%arg0: i32, %arg1: i32, %arg2: i32) -> (i32, i32) {
    %c0_i32 = arith.constant 0 : i32
    return %arg1, %arg2 : i32, i32
  }
  func.func @transform_3(%arg0: i32, %arg1: i32, %arg2: i32) -> (i32, i32) {
    %c0_i32 = arith.constant 0 : i32
    return %arg1, %arg2 : i32, i32
  }
  func.func @transform_4(%arg0: i32, %arg1: i32, %arg2: i32) -> (i32, i32) {
    %c0_i32 = arith.constant 0 : i32
    %c0_i32_0 = arith.constant 0 : i32
    return %c0_i32, %arg1 : i32, i32
  }
  func.func @transform_5(%arg0: i32, %arg1: i32, %arg2: i32) -> (i32, i32) {
    %c0_i32 = arith.constant 0 : i32
    %c0_i32_0 = arith.constant 0 : i32
    return %c0_i32, %arg1 : i32, i32
  }
  func.func @transform_6(%arg0: i32, %arg1: i32, %arg2: i32) -> (i32, i32) {
    %c0_i32 = arith.constant 0 : i32
    %c0_i32_0 = arith.constant 0 : i32
    return %c0_i32, %arg1 : i32, i32
  }
  func.func @transform_7(%arg0: i32, %arg1: i32, %arg2: i32) -> (i32, i32) {
    %c0_i32 = arith.constant 0 : i32
    return %arg0, %arg1 : i32, i32
  }
}

</mosaic_0001>

<bundles_post_ra>
// kernel: tpu_custom_call.1
= control target key start
LH: loop header
LB: loop body
LE: loop exit
PB: predicated region body
PF: predicated region fallthrough
CT: control target
= control target key end

     0   :  { %12 = vsyncpa [#allocation4], 0  ;;  %s612_s0 = inlined_call_operand.hbm [shape: f32[8,128], index: 0, kind: input, shape index: {}]   ;;  %s613_s1 = inlined_call_operand.hbm [shape: f32[128,128], index: 1, kind: input, shape index: {}]   ;;  %s614_s2 = inlined_call_operand.hbm [shape: f32[128,128], index: 2, kind: input, shape index: {}]   ;;  %s615_s3 = inlined_call_operand.hbm [shape: f32[128,128], index: 3, kind: input, shape index: {}]   ;;  %s616_s4 = inlined_call_operand.vmem [shape: f32[1,128], index: 4, kind: input, shape index: {}]   ;;  %s617_s5 = inlined_call_operand.vmem [shape: f32[1,128], index: 5, kind: input, shape index: {}]   ;;  %s618_s6 = inlined_call_operand.vmem [shape: f32[1,128], index: 6, kind: input, shape index: {}]   ;;  %s619_s7 = inlined_call_operand.hbm [shape: f32[8,128], index: 7, kind: output, shape index: {}]  }
   0x1   :  { %13 = vsyncpa [#allocation7], 0 }
   0x2   :  { %14 = vsyncpa [#allocation10], 0 }
   0x3   :  { %15 = vsyncpa [#allocation5], 0  ;;  %s476_s24 = smov [#allocation6]   ;;  %s358_s28 = scalar_lea.hbm %s613_s1, 2048 }
   0x4   :  { %s31_s25 = sshll.u32 %s476_s24, 4  ;;  %p359_p0 = scmp.ne.s32.totalorder %s613_s1, %s358_s28  ;;  %s32_s25 = int_to_ptr.vmem [resolvable:$true] %s31_s25 }
   0x5   :  { %p362_p1 = scmp.lt.u32.totalorder %s358_s28, %s613_s1 }
   0x7   :  { %p364_p2 = pnand %p362_p1, %p359_p0 }
   0x9   :  { %367 = shalt.err (!%p364_p2)
}
   0xa   :  { %s368_s10 = scalar_lea.vmem %s32_s25, 2048  ;;  %p373_p4 = scmp.lt.s32.totalorder %s32_s25, %s32_s25 }
   0xb   :  { %p369_p3 = scmp.ne.s32.totalorder %s32_s25, %s368_s10  ;;  %p374_p5 = scmp.lt.s32.totalorder %s368_s10, %s368_s10 }
   0xd   :  { %p375_p6 = por %p374_p5, %p373_p4 }
   0xf   :  { %p376_p7 = pnand %p375_p6, %p369_p3 }
  0x11   :  { %379 = shalt.err (!%p376_p7)
}
  0x12   :  { %s477_s11 = smov 128   ;;  %s478_s12 = smov 8  }
  0x13   :  { %37 = dma.hbm_to_vmem [thread:$0]  %s613_s1, 2048, %s32_s25, [#allocation7], %s477_s11, %s477_s11, %s478_s12  }
  0x14   :  { %s479_s15 = smov [#allocation3]   ;;  %s480_s17 = smov [#allocation8]  }
  0x15   :  { %s22_s16 = sshll.u32 %s479_s15, 4  ;;  %s43_s18 = sshll.u32 %s480_s17, 4  ;;  %s23_s16 = int_to_ptr.vmem [resolvable:$true] %s22_s16  ;;  %s44_s18 = int_to_ptr.vmem [resolvable:$true] %s43_s18 }
  0x16   :  { %s380_s21 = scalar_lea.hbm %s612_s0, 128 }
  0x17   :  { %p381_p8 = scmp.ne.s32.totalorder %s612_s0, %s380_s21  ;;  %p384_p9 = scmp.lt.u32.totalorder %s380_s21, %s612_s0 }
  0x19   :  { %p386_p10 = pnand %p384_p9, %p381_p8 }
  0x1b   :  { %389 = shalt.err (!%p386_p10)
}
  0x1c   :  { %s390_s1 = scalar_lea.vmem %s23_s16, 128  ;;  %p395_p12 = scmp.lt.s32.totalorder %s23_s16, %s23_s16 }
  0x1d   :  { %p391_p11 = scmp.ne.s32.totalorder %s23_s16, %s390_s1  ;;  %p396_p13 = scmp.lt.s32.totalorder %s390_s1, %s390_s1 }
  0x1f   :  { %p397_p0 = por %p396_p13, %p395_p12 }
  0x21   :  { %p398_p1 = pnand %p397_p0, %p391_p11 }
  0x23   :  { %401 = shalt.err (!%p398_p1)
}
  0x24   :  { %25 = dma.hbm_to_vmem [thread:$0]  %s612_s0, 128, %s23_s16, [#allocation4]  }
  0x25   :  { %s402_s30 = scalar_lea.hbm %s614_s2, 2048 }
  0x26   :  { %p403_p2 = scmp.ne.s32.totalorder %s614_s2, %s402_s30  ;;  %p406_p3 = scmp.lt.u32.totalorder %s402_s30, %s614_s2 }
  0x28   :  { %p408_p4 = pnand %p406_p3, %p403_p2 }
  0x2a   :  { %411 = shalt.err (!%p408_p4)
}
  0x2b   :  { %s412_s14 = scalar_lea.vmem %s44_s18, 2048  ;;  %p417_p6 = scmp.lt.s32.totalorder %s44_s18, %s44_s18 }
  0x2c   :  { %p413_p5 = scmp.ne.s32.totalorder %s44_s18, %s412_s14  ;;  %p418_p7 = scmp.lt.s32.totalorder %s412_s14, %s412_s14 }
  0x2e   :  { %p419_p8 = por %p418_p7, %p417_p6 }
  0x30   :  { %p420_p9 = pnand %p419_p8, %p413_p5 }
  0x32   :  { %423 = shalt.err (!%p420_p9)
}
  0x33   :  { %49 = dma.hbm_to_vmem [thread:$0]  %s614_s2, 2048, %s44_s18, [#allocation7], %s477_s11, %s477_s11, %s478_s12  }
  0x34   :  { %s481_s16 = smov [#allocation9]   ;;  %s424_s21 = scalar_lea.hbm %s615_s3, 2048 }
  0x35   :  { %s55_s17 = sshll.u32 %s481_s16, 4  ;;  %p425_p10 = scmp.ne.s32.totalorder %s615_s3, %s424_s21  ;;  %s56_s17 = int_to_ptr.vmem [resolvable:$true] %s55_s17 }
  0x36   :  { %p428_p11 = scmp.lt.u32.totalorder %s424_s21, %s615_s3 }
  0x38   :  { %p430_p12 = pnand %p428_p11, %p425_p10 }
  0x3a   :  { %433 = shalt.err (!%p430_p12)
}
  0x3b   :  { %s434_s1 = scalar_lea.vmem %s56_s17, 2048  ;;  %p439_p0 = scmp.lt.s32.totalorder %s56_s17, %s56_s17 }
  0x3c   :  { %p435_p13 = scmp.ne.s32.totalorder %s56_s17, %s434_s1  ;;  %p440_p1 = scmp.lt.s32.totalorder %s434_s1, %s434_s1 }
  0x3e   :  { %p441_p2 = por %p440_p1, %p439_p0 }
  0x40   :  { %p442_p3 = pnand %p441_p2, %p435_p13 }
  0x42   :  { %445 = shalt.err (!%p442_p3)
}
  0x43   :  { %61 = dma.hbm_to_vmem [thread:$0]  %s615_s3, 2048, %s56_s17, [#allocation10], %s477_s11, %s477_s11, %s478_s12  }
  0x44   :  { %468 = dma.done.wait [#allocation4], 128  }
  0x45   :  { %469 = vsyncadd [#allocation4], 4294967168 }
  0x46   :  { %470 = dma.done.wait [#allocation7], 4096  }
  0x47   :  { %471 = vsyncadd [#allocation7], 4294963200 }
  0x48   :  { %472 = dma.done.wait [#allocation10], 2048  }
  0x49   :  { %473 = vsyncadd [#allocation10], 4294965248  ;;  %v482_v0 = vmov 0.0|0.0   ;;  %vm483_vm0 = vmmov 0   ;;  %v484_v1 = vmov 0.0   ;;  %v96_v2 = vld [vmem:[#allocation6] sm:$0xff] }
  0x4a   :  { %324 = vmatprep.subr.bf16.mxu0 %v482_v0  ;;  %321 = vmatprep.mubr.msk.f32.mxu0 %vm483_vm0, %v484_v1  ;;  %v97_v3 = vld [vmem:[#allocation6 + $0x8] sm:$0xff]  ;;  %v112_v4 = vld [vmem:[#allocation8] sm:$0xff]  ;;  %v114_v10 = vld [vmem:[#allocation8 + $0x10] sm:$0xff]  ;;  %s485_s29 = smov [#allocation11]  }
  0x4b   :  { %v113_v5 = vld [vmem:[#allocation8 + $0x8] sm:$0xff]  ;;  %v128_v6 = vld [vmem:[#allocation9] sm:$0xff]  ;;  %v115_v11 = vld [vmem:[#allocation8 + $0x18] sm:$0xff]  ;;  %s261_s30 = sshll.u32 %s485_s29, 4  ;;  %s262_s30 = int_to_ptr.vmem [resolvable:$true] %s261_s30 }
  0x4c   :  { %v129_v7 = vld [vmem:[#allocation9 + $0x8] sm:$0xff]  ;;  %v144_v8 = vmul.f32 %v128_v6, %v112_v4  ;;  %v130_v12 = vld [vmem:[#allocation9 + $0x10] sm:$0xff]  ;;  %v131_v13 = vld [vmem:[#allocation9 + $0x18] sm:$0xff]  ;;  %p451_p5 = scmp.lt.s32.totalorder %s262_s30, %s262_s30 }
  0x4d   :  { %v145_v9 = vmul.f32 %v129_v7, %v113_v5  ;;  %v146_v16 = vmul.f32 %v130_v12, %v114_v10  ;;  %v147_v17 = vmul.f32 %v131_v13, %v115_v11  ;;  %v98_v18 = vld [vmem:[#allocation6 + $0x10] sm:$0xff]  ;;  %v99_v19 = vld [vmem:[#allocation6 + $0x18] sm:$0xff]  ;;  %v116_v23 = vld [vmem:[#allocation8 + $0x20] sm:$0xff] }
  0x4e   :  { %v160_v14 = vadd.f32 %v144_v8, %v96_v2  ;;  %v117_v24 = vld [vmem:[#allocation8 + $0x28] sm:$0xff]  ;;  %v132_v25 = vld [vmem:[#allocation9 + $0x20] sm:$0xff]  ;;  %v118_v34 = vld [vmem:[#allocation8 + $0x30] sm:$0xff] }
  0x4f   :  { %v161_v15 = vadd.f32 %v145_v9, %v97_v3  ;;  %v162_v21 = vadd.f32 %v146_v16, %v98_v18  ;;  %v163_v22 = vadd.f32 %v147_v17, %v99_v19  ;;  %v133_v26 = vld [vmem:[#allocation9 + $0x28] sm:$0xff]  ;;  %v148_v28 = vmul.f32 %v132_v25, %v116_v23  ;;  %v100_v30 = vld [vmem:[#allocation6 + $0x20] sm:$0xff]  ;;  %v119_v35 = vld [vmem:[#allocation8 + $0x38] sm:$0xff] }
  0x50   :  { %v149_v29 = vmul.f32 %v133_v26, %v117_v24  ;;  %v101_v31 = vld [vmem:[#allocation6 + $0x28] sm:$0xff]  ;;  %v134_v36 = vld [vmem:[#allocation9 + $0x30] sm:$0xff]  ;;  %v135_v37 = vld [vmem:[#allocation9 + $0x38] sm:$0xff] }
  0x51   :  { %v325_v20 = vpack.c.bf16 %v161_v15, %v160_v14  ;;  %v328_v27 = vpack.c.bf16 %v163_v22, %v162_v21  ;;  %v164_v32 = vadd.f32 %v148_v28, %v100_v30  ;;  %v150_v39 = vmul.f32 %v134_v36, %v118_v34  ;;  %v102_v41 = vld [vmem:[#allocation6 + $0x30] sm:$0xff]  ;;  %v103_v42 = vld [vmem:[#allocation6 + $0x38] sm:$0xff]  ;;  %v120_v45 = vld [vmem:[#allocation8 + $0x40] sm:$0xff] }
  0x52   :  { %v165_v33 = vadd.f32 %v149_v29, %v101_v31  ;;  %v151_v40 = vmul.f32 %v135_v37, %v119_v35  ;;  %v121_v46 = vld [vmem:[#allocation8 + $0x48] sm:$0xff]  ;;  %v136_v47 = vld [vmem:[#allocation9 + $0x40] sm:$0xff]  ;;  %v122_v56 = vld [vmem:[#allocation8 + $0x50] sm:$0xff]  ;;  %v90_v28 = vlaneseq }
  0x53   :  { %326 = vmatpush3.bf16.xpose.msra.mxu0 %v325_v20  ;;  %v166_v43 = vadd.f32 %v150_v39, %v102_v41  ;;  %v137_v48 = vld [vmem:[#allocation9 + $0x48] sm:$0xff]  ;;  %v152_v50 = vmul.f32 %v136_v47, %v120_v45  ;;  %v104_v52 = vld [vmem:[#allocation6 + $0x40] sm:$0xff]  ;;  %v123_v57 = vld [vmem:[#allocation8 + $0x58] sm:$0xff] }
  0x54   :  { %327 = vmatprep.subr.bf16.mxu0 %v482_v0  ;;  %v331_v38 = vpack.c.bf16 %v165_v33, %v164_v32  ;;  %v167_v44 = vadd.f32 %v151_v40, %v103_v42  ;;  %v153_v51 = vmul.f32 %v137_v48, %v121_v46  ;;  %v105_v53 = vld [vmem:[#allocation6 + $0x48] sm:$0xff]  ;;  %v138_v58 = vld [vmem:[#allocation9 + $0x50] sm:$0xff]  ;;  %v139_v59 = vld [vmem:[#allocation9 + $0x58] sm:$0xff]  ;;  %v91_v32 = vshrl.u32 %v90_v28, 7 }
  0x55   :  { %v168_v54 = vadd.f32 %v152_v50, %v104_v52  ;;  %v154_v61 = vmul.f32 %v138_v58, %v122_v56  ;;  %v155_v62 = vmul.f32 %v139_v59, %v123_v57  ;;  %v106_v63 = vld [vmem:[#allocation6 + $0x50] sm:$0xff]  ;;  %v107_v1 = vld [vmem:[#allocation6 + $0x58] sm:$0xff]  ;;  %v124_v4 = vld [vmem:[#allocation8 + $0x60] sm:$0xff] }
  0x56   :  { %v334_v49 = vpack.c.bf16 %v167_v44, %v166_v43  ;;  %v169_v55 = vadd.f32 %v153_v51, %v105_v53  ;;  %v125_v5 = vld [vmem:[#allocation8 + $0x68] sm:$0xff]  ;;  %v140_v6 = vld [vmem:[#allocation9 + $0x60] sm:$0xff]  ;;  %v126_v15 = vld [vmem:[#allocation8 + $0x70] sm:$0xff]  ;;  %v92_v34 = vsub.s32 0, %v91_v32 }
  0x57   :  { %v170_v2 = vadd.f32 %v154_v61, %v106_v63  ;;  %v171_v3 = vadd.f32 %v155_v62, %v107_v1  ;;  %v141_v7 = vld [vmem:[#allocation9 + $0x68] sm:$0xff]  ;;  %v156_v9 = vmul.f32 %v140_v6, %v124_v4  ;;  %v108_v11 = vld [vmem:[#allocation6 + $0x60] sm:$0xff]  ;;  %v127_v16 = vld [vmem:[#allocation8 + $0x78] sm:$0xff] }
  0x58   :  { %v337_v60 = vpack.c.bf16 %v169_v55, %v168_v54  ;;  %v157_v10 = vmul.f32 %v141_v7, %v125_v5  ;;  %v109_v12 = vld [vmem:[#allocation6 + $0x68] sm:$0xff]  ;;  %v142_v17 = vld [vmem:[#allocation9 + $0x70] sm:$0xff]  ;;  %v143_v18 = vld [vmem:[#allocation9 + $0x78] sm:$0xff] }
  0x59   :  { %v340_v8 = vpack.c.bf16 %v171_v3, %v170_v2  ;;  %v172_v13 = vadd.f32 %v156_v9, %v108_v11  ;;  %v158_v20 = vmul.f32 %v142_v17, %v126_v15  ;;  %v159_v21 = vmul.f32 %v143_v18, %v127_v16  ;;  %v110_v22 = vld [vmem:[#allocation6 + $0x70] sm:$0xff]  ;;  %v111_v23 = vld [vmem:[#allocation6 + $0x78] sm:$0xff] }
  0x5a   :  { %v173_v14 = vadd.f32 %v157_v10, %v109_v12  ;;  %v85_v29 = vld [vmem:[%s617_s5] sm:$0x1]  ;;  %s446_s5 = scalar_lea.vmem %s262_s30, 128 }
  0x5b   :  { %329 = vmatpush3.bf16.xpose.msra.mxu0 %v328_v27  ;;  %v174_v24 = vadd.f32 %v158_v20, %v110_v22  ;;  %v175_v25 = vadd.f32 %v159_v21, %v111_v23  ;;  %v176_v27 = vld [vmem:[#allocation3] sm:$0xff]  ;;  %p447_p4 = scmp.ne.s32.totalorder %s262_s30, %s446_s5  ;;  %p452_p6 = scmp.lt.s32.totalorder %s446_s5, %s446_s5 }
  0x5c   :  { %330 = vmatprep.subr.bf16.mxu0 %v482_v0  ;;  %v343_v19 = vpack.c.bf16 %v173_v14, %v172_v13  ;;  %v86_v30 = vld [vmem:[%s618_s6] sm:$0x1] }
  0x5d   :  { %v346_v26 = vpack.c.bf16 %v175_v25, %v174_v24  ;;  %v87_v31 = vmul.f32 %v86_v30, %v85_v29  ;;  %v84_v33 = vld [vmem:[%s616_s4] sm:$0x1]  ;;  %p453_p7 = por %p452_p6, %p451_p5 }
  0x5f   :  { %p454_p8 = pnand %p453_p7, %p447_p4 }
  0x63   :  { %332 = vmatpush3.bf16.xpose.msra.mxu0 %v331_v38 }
  0x64   :  { %333 = vmatprep.subr.bf16.mxu0 %v482_v0 }
  0x6b   :  { %335 = vmatpush3.bf16.xpose.msra.mxu0 %v334_v49 }
  0x6c   :  { %336 = vmatprep.subr.bf16.mxu0 %v482_v0 }
  0x73   :  { %338 = vmatpush3.bf16.xpose.msra.mxu0 %v337_v60 }
  0x74   :  { %339 = vmatprep.subr.bf16.mxu0 %v482_v0 }
  0x7b   :  { %341 = vmatpush3.bf16.xpose.msra.mxu0 %v340_v8 }
  0x7c   :  { %342 = vmatprep.subr.bf16.mxu0 %v482_v0 }
  0x83   :  { %344 = vmatpush3.bf16.xpose.msra.mxu0 %v343_v19 }
  0x84   :  { %345 = vmatprep.subr.bf16.mxu0 %v482_v0  ;;  %v88_v0 = vadd.f32 %v87_v31, %v84_v33 }
  0x86   :  { %v93_v35 = vrot.slane %v88_v0, %v92_v34 }
  0x8b   :  { %347 = vmatpush3.bf16.xpose.msra.mxu0 %v346_v26 }
  0x92   :  { %322 = vmatmul.mubr.f32.vlgmr.msra.gmra.mrb[0].mxu0 %v176_v27 }
 0x165   :  { %v244_v36 = vpop.f32.mrb[0].mxu0 }
 0x166   :  { %v248_v37 = vadd.f32 %v244_v36, %v93_v35  ;;  %v323_v38 = vpop.f32.mrb[1].mxu0 }
 0x168   :  { %254 = vst [vmem:[#allocation11] sm:$0xff] %v248_v37 }
 0x169   :  { %457 = shalt.err (!%p454_p8)
}
 0x16a   :  { %s458_s4 = scalar_lea.hbm %s619_s7, 128 }
 0x16b   :  { %p459_p9 = scmp.ne.s32.totalorder %s619_s7, %s458_s4  ;;  %p462_p10 = scmp.lt.u32.totalorder %s458_s4, %s619_s7 }
 0x16d   :  { %p464_p11 = pnand %p462_p10, %p459_p9 }
 0x16f   :  { %467 = shalt.err (!%p464_p11)
}
 0x170   :  { %264 = dma.vmem_to_hbm [thread:$0]  %s262_s30, 128, %s619_s7, [#allocation5]  }
 0x171   :  { %474 = dma.done.wait [#allocation5], 128  }
 0x172   :  { %475 = vsyncadd [#allocation5], 4294967168 }
 0x173   :  { %268 = vsyncpa [#allocation4], 1 }
 0x174   :  { %269 = vsyncpa [#allocation7], 1 }
 0x175   :  { %270 = vsyncpa [#allocation10], 1 }
 0x176   :  { %271 = vsyncpa [#allocation5], 1 }

</bundles_post_ra>
